<compile_context>
chip_gen: v7x
topology: tpu7x:2x2x1
jax: 0.10.0
libtpu: 0.0.40
codegen_flags: <defaults>
</compile_context>

<pallas_src>
import jax
import jax.numpy as jnp
from jax.experimental import pallas as pl
from jax.experimental.pallas import tpu as pltpu


# ----------------------------- Pallas kernel ------------------------------ #
def _fused_conv1x1_relu_kernel(x_ref, w_ref, o_ref):
    # x_ref: (N*C_in + 1, HW)      last row is constant 1s (bias lane)
    # w_ref: (N*C_out, N*C_in + 1) block-diagonal weight, bias as last column
    # o_ref: (N*C_out, HW)         16 sublanes x 256 lanes -> unmasked stores
    acc = jnp.dot(w_ref[...], x_ref[...], preferred_element_type=jnp.float32)
    o_ref[...] = jnp.maximum(acc, 0.0).astype(o_ref.dtype)


def conv1x1_relu_fused(x_aug, w_aug):
    """x_aug: (N*C_in+1, HW) f32, w_aug: (N*C_out, N*C_in+1) f32
    -> (N*C_out, HW) f32 = relu(w_aug @ x_aug)."""
    k_aug, hw = x_aug.shape
    m = w_aug.shape[0]
    cost = pl.CostEstimate(
        flops=2 * m * k_aug * hw,
        transcendentals=0,
        bytes_accessed=4 * (x_aug.size + w_aug.size + m * hw),
    )
    # No grid: the whole problem (~24 KB) is a single VMEM-resident block on
    # every TPU generation; a grid would only add per-step overhead and
    # double-buffered copies of every operand.
    return pl.pallas_call(
        _fused_conv1x1_relu_kernel,
        out_shape=jax.ShapeDtypeStruct((m, hw), jnp.float32),
        in_specs=[
            pl.BlockSpec(memory_space=pltpu.MemorySpace.VMEM),
            pl.BlockSpec(memory_space=pltpu.MemorySpace.VMEM),
        ],
        out_specs=pl.BlockSpec(memory_space=pltpu.MemorySpace.VMEM),
        cost_estimate=cost,
    )(x_aug, w_aug)


# --------------------- Inner module (the wrapped `mod`) -------------------- #
def make_inner_mod(c_in=4, c_out=8):
    """Deterministic 1x1-conv + bias + ReLU inner module.

    Mimics the NNAPI convention: takes a List[Tensor] of inputs, returns a
    List[Tensor] of outputs (here exactly one).
    """
    kw, kb = jax.random.split(jax.random.PRNGKey(42))
    # PyTorch Conv2d weight shape is (C_out, C_in, 1, 1); stored here directly
    # as the equivalent (C_out, C_in) matmul weight.
    w = jax.random.normal(kw, (c_out, c_in), dtype=jnp.float32) * 0.1
    b = jax.random.normal(kb, (c_out,), dtype=jnp.float32) * 0.1

    def inner_mod(ts):
        (x,) = ts                        # single NCHW input tensor
        n, c, h, wdt = x.shape
        assert c == c_in
        hw = h * wdt

        # Block-diagonal weight over the batch with the bias folded in as the
        # last column:  w_aug @ [x ; 1] == block_diag(w, ..., w) @ x + tile(b).
        # Tiny (16x9) constant construction; fused/overlapped by XLA under jit.
        w_blk = jnp.kron(jnp.eye(n, dtype=jnp.float32), w)        # (n*c_out, n*c_in)
        b_col = jnp.tile(b, n).reshape(n * c_out, 1)               # (n*c_out, 1)
        w_aug = jnp.concatenate([w_blk, b_col], axis=1)            # (n*c_out, n*c_in+1)

        # NCHW stores H*W contiguously per (n, c): collapsing to (N*C_in, HW)
        # is a free reshape.  Append the constant-1 bias row.
        x2 = x.reshape(n * c_in, hw)                               # (n*c_in, hw)
        x_aug = jnp.concatenate(
            [x2, jnp.ones((1, hw), dtype=x2.dtype)], axis=0)       # (n*c_in+1, hw)

        y2 = conv1x1_relu_fused(x_aug, w_aug)                      # (n*c_out, hw)
        y = y2.reshape(n, c_out, h, wdt)                           # back to NCHW, free
        return [y]                       # list of outputs, length 1

    return inner_mod


# --------------------------- DelistWrapper.forward ------------------------- #
def delist_wrapper_forward(mod, ts):
    """Exact semantics of DelistWrapper.forward."""
    outs = mod(ts)
    assert len(outs) == 1
    return outs[0]


# ---------------------------------- main ----------------------------------- #
if __name__ == "__main__":
    key = jax.random.PRNGKey(0)
    # NCHW input consistent with a small conv model: batch=2, channels=4, 16x16
    x = jax.random.normal(key, (2, 4, 16, 16), dtype=jnp.float32)

    mod = make_inner_mod(c_in=4, c_out=8)

    # jit the whole forward so the free reshapes / tiny concats fuse with the
    # pallas_call dispatch.
    fwd = jax.jit(lambda inp: delist_wrapper_forward(mod, [inp]))
    out = jax.block_until_ready(fwd(x))

    assert out.shape == (2, 8, 16, 16)
    assert out.dtype == jnp.float32
    print("KERNEL_OK")
</pallas_src>

<mosaic_0001>
module attributes {stable_mosaic.version = 11 : i64} {
  func.func @_fused_conv1x1_relu_kernel(%arg0: memref<9x256xf32, #tpu.memory_space<vmem>>, %arg1: memref<16x9xf32, #tpu.memory_space<vmem>>, %arg2: memref<16x256xf32, #tpu.memory_space<vmem>>) attributes {dimension_semantics = [], scalar_prefetch = 0 : i64, scratch_operands = 0 : i64, tpu.core_type = #tpu.core_type<tc>} {
    %c0 = arith.constant 0 : index
    %c0_0 = arith.constant 0 : index
    %0 = vector.load %arg1[%c0, %c0_0] : memref<16x9xf32, #tpu.memory_space<vmem>>, vector<16x9xf32>
    %c0_1 = arith.constant 0 : index
    %c0_2 = arith.constant 0 : index
    %1 = vector.load %arg0[%c0_1, %c0_2] : memref<9x256xf32, #tpu.memory_space<vmem>>, vector<9x256xf32>
    %cst = arith.constant dense<0.000000e+00> : vector<16x256xf32>
    %2 = tpu.matmul %0, %1, %cst {dimension_numbers = #tpu.dot_dimension_numbers<[1], [0], [0], [1], [0, 0, 1, 1], [], []>} : vector<16x9xf32>, vector<9x256xf32>, vector<16x256xf32> -> vector<16x256xf32>
    %cst_3 = arith.constant 0.000000e+00 : f32
    %3 = vector.broadcast %cst_3 : f32 to vector<16x256xf32>
    %4 = arith.maximumf %2, %3 : vector<16x256xf32>
    %c0_4 = arith.constant 0 : index
    %c0_5 = arith.constant 0 : index
    %5 = vector.load %arg2[%c0_4, %c0_5] : memref<16x256xf32, #tpu.memory_space<vmem>>, vector<16x256xf32>
    tpu.vector_store %arg2[%c0_4, %c0_5], %4 {strides = array<i32>} : memref<16x256xf32, #tpu.memory_space<vmem>>, vector<16x256xf32>,
    return
  }
}

</mosaic_0001>

<bundles_post_ra>
// kernel: tile.0
= control target key start
LH: loop header
LB: loop body
LE: loop exit
PB: predicated region body
PF: predicated region fallthrough
CT: control target
= control target key end

     0   :  { %s66_s8 = smov 125   ;;  %vm7_vm0 = vcmask 7168   ;;  %s67_s11 = smov 126   ;;  %s117_s0 = inlined_call_operand.vmem [shape: f32[2,8], index: 0, kind: input, shape index: {}]   ;;  %s118_s1 = inlined_call_operand.vmem [shape: f32[16,1], index: 1, kind: output, shape index: {}]  }
   0x1   :  { %v4_v0 = vld [vmem:[%s117_s0] sm:$0x3]  ;;  %s65_s0 = smov 127   ;;  %s68_s12 = smov 124  }
   0x2   :  { %5 = vst [vmem:[#allocation0] sm:$0x3] %v4_v0  ;;  %s69_s13 = smov 123   ;;  %s70_s14 = smov 122  }
   0x3   :  { %s71_s15 = smov 121  }
   0x9   :  { %v9_v1 = vld [vmem:[#allocation0] sm:$0x3]  }
   0xa   :  { %v21_v2 = vld [vmem:[#allocation0] sm:$0x3]   ;;  %10 = vrot.lane.b32.xlu0 %v9_v1, %s65_s0 }
   0xb   :  { %22 = vrot.lane.b32.xlu1 %v21_v2, %s66_s8  ;;  %v15_v3 = vld [vmem:[#allocation0] sm:$0x3]  }
   0xc   :  { %v27_v4 = vld [vmem:[#allocation0] sm:$0x3]  }
   0xd   :  { %v6_v5 = vld [vmem:[#allocation0] sm:$0x3]  }
   0xe   :  { %8 = vst.msk [vmem:[%s118_s1] ss:$8 sm:$0x3] %vm7_vm0, %v6_v5   ;;  %16 = vrot.lane.b32.xlu0 %v15_v3, %s67_s11  ;;  %v33_v6 = vld [vmem:[#allocation0] sm:$0x3]  }
   0xf   :  { %28 = vrot.lane.b32.xlu1 %v27_v4, %s68_s12  ;;  %v39_v7 = vld [vmem:[#allocation0] sm:$0x3]  }
  0x10   :  { %v45_v8 = vld [vmem:[#allocation0] sm:$0x3]  }
  0x12   :  { %34 = vrot.lane.b32.xlu0 %v33_v6, %s69_s13 }
  0x13   :  { %40 = vrot.lane.b32.xlu1 %v39_v7, %s70_s14 }
  0x16   :  { %46 = vrot.lane.b32.xlu0 %v45_v8, %s71_s15 }
  0x7c   :  { %v11_v9 = vpop.permute.xlu0 %10  }
  0x7d   :  { %v23_v10 = vpop.permute.xlu1 %22   ;;  %51 = vst.msk [vmem:[%s118_s1 + $0x1] ss:$8 sm:$0x3] %vm7_vm0, %v11_v9  }
  0x7e   :  { %53 = vst.msk [vmem:[%s118_s1 + $0x3] ss:$8 sm:$0x3] %vm7_vm0, %v23_v10  }
  0x80   :  { %v17_v11 = vpop.permute.xlu0 %16  }
  0x81   :  { %v29_v12 = vpop.permute.xlu1 %28   ;;  %52 = vst.msk [vmem:[%s118_s1 + $0x2] ss:$8 sm:$0x3] %vm7_vm0, %v17_v11  }
  0x82   :  { %54 = vst.msk [vmem:[%s118_s1 + $0x4] ss:$8 sm:$0x3] %vm7_vm0, %v29_v12  }
  0x84   :  { %v35_v13 = vpop.permute.xlu0 %34  }
  0x85   :  { %v41_v14 = vpop.permute.xlu1 %40   ;;  %55 = vst.msk [vmem:[%s118_s1 + $0x5] ss:$8 sm:$0x3] %vm7_vm0, %v35_v13  }
  0x86   :  { %56 = vst.msk [vmem:[%s118_s1 + $0x6] ss:$8 sm:$0x3] %vm7_vm0, %v41_v14  }
  0x88   :  { %v47_v15 = vpop.permute.xlu0 %46  }
  0x89   :  { %57 = vst.msk [vmem:[%s118_s1 + $0x7] ss:$8 sm:$0x3] %vm7_vm0, %v47_v15  }

// kernel: tile.6
= control target key start
LH: loop header
LB: loop body
LE: loop exit
PB: predicated region body
PF: predicated region fallthrough
CT: control target
= control target key end

     0   :  { %s22_s0 = inlined_call_operand.vmem [shape: f32[8], index: 0, kind: input, shape index: {}]   ;;  %s23_s1 = inlined_call_operand.vmem [shape: f32[2,8], index: 1, kind: output, shape index: {}]  }
   0x1   :  { %v4_v0 = vld [vmem:[%s22_s0] ss:$0 sm:$0xff] }
   0x2   :  { %5 = vst [vmem:[%s23_s1] sm:$0x3] %v4_v0 }

// kernel: _lambda_.1
= control target key start
LH: loop header
LB: loop body
LE: loop exit
PB: predicated region body
PF: predicated region fallthrough
CT: control target
= control target key end

     0   :  { %vm24_vm0 = vcmask 1040384   ;;  %vm134_vm1 = vmmov 1   ;;  %v135_v2 = vmov 0.0   ;;  %vm17_vm3 = vcmask 72704   ;;  %s181_s0 = inlined_call_operand.vmem [shape: f32[9,256], index: 0, kind: input, shape index: {}]   ;;  %s182_s1 = inlined_call_operand.vmem [shape: f32[16,9], index: 1, kind: input, shape index: {}]   ;;  %s183_s2 = inlined_call_operand.vmem [shape: f32[16,256], index: 2, kind: output, shape index: {}]  }
   0x1   :  { %v14_v0 = vld [vmem:[%s181_s0 + $0x8] sm:$0xff]  ;;  %v16_v1 = vld [vmem:[%s181_s0 + $0x18] sm:$0x1]  ;;  %vm125_vm2 = vmpackc.low %vm24_vm0, %vm134_vm1  ;;  %95 = vmatprep.mubr.f32.mxu0 %v135_v2  ;;  %101 = vmatprep.mubr.f32.mxu1 %v135_v2 }
   0x2   :  { %v124_v3 = vpack.c.bf16 %v16_v1, %v14_v0  ;;  %v13_v4 = vld [vmem:[%s181_s0] sm:$0xff]  ;;  %v15_v5 = vld [vmem:[%s181_s0 + $0x10] sm:$0x1]  ;;  %v12_v8 = vld [vmem:[%s182_s1 + $0x8] sm:$0xff] }
   0x3   :  { %v127_v6 = vpack.c.bf16 %v15_v5, %v13_v4  ;;  %v11_v7 = vld [vmem:[%s182_s1] sm:$0xff] }
   0x4   :  { %126 = vmatprep.subr.msk.bf16.mxu0 %vm125_vm2, %v124_v3  ;;  %130 = vmatprep.subr.msk.bf16.mxu1 %vm125_vm2, %v124_v3 }
   0x5   :  { %129 = vmatpush1.bf16.msk.msra.mxu0 %vm125_vm2, %v127_v6  ;;  %131 = vmatpush1.bf16.msk.msra.mxu1 %vm125_vm2, %v127_v6 }
   0x8   :  { %122 = vmatmul.mubr.msk.f32.vlgmr.msra.gmra.mrb[0].mxu0 %vm17_vm3, %v11_v7  ;;  %123 = vmatmul.mubr.msk.f32.vlgmr.msra.gmra.mrb[0].mxu1 %vm17_vm3, %v12_v8 }
  0xdb   :  { %v97_v9 = vpop.f32.mrb[0].mxu0  ;;  %v103_v10 = vpop.f32.mrb[0].mxu1 }
  0xdc   :  { %v108_v11 = vmax.f32 %v97_v9, 0.0  ;;  %v110_v12 = vmax.f32 %v103_v10, 0.0  ;;  %v99_v13 = vpop.f32.mrb[1].mxu0  ;;  %v105_v14 = vpop.f32.mrb[1].mxu1 }
  0xdd   :  { %v109_v15 = vmax.f32 %v99_v13, 0.0  ;;  %v111_v16 = vmax.f32 %v105_v14, 0.0 }
  0xde   :  { %112 = vst [vmem:[%s183_s2] sm:$0xff] %v108_v11  ;;  %114 = vst [vmem:[%s183_s2 + $0x10] sm:$0xff] %v110_v12 }
  0xdf   :  { %113 = vst [vmem:[%s183_s2 + $0x8] sm:$0xff] %v109_v15  ;;  %115 = vst [vmem:[%s183_s2 + $0x18] sm:$0xff] %v111_v16 }

</bundles_post_ra>
